<compile_context>
chip_gen: v6e
topology: v6e:2x2x1
jax: 0.10.0
libtpu: 0.0.40
codegen_flags: <defaults>
</compile_context>

<pallas_src>
import math
from functools import partial

import jax
import jax.numpy as jnp
from jax.experimental import pallas as pl
from jax.experimental.pallas import tpu as pltpu


def _cross_attention_kernel(q_ref, k_ref, v_ref, w_ref, b_ref, wl_ref, bl_ref,
                            o_ref, *, d_model, n_head):
    """One batch element per grid step; all heads processed in-step.

    Block shapes:
      q_ref : (1, Lq, D)      k_ref : (1, Lk, D)      v_ref : (1, Lq, D)
      w_ref : (3, D, H*D)     stacked [Wq; Wk; Wv] in x @ W layout (VMEM-resident)
      b_ref : (3, 1, H*D)     stacked biases (VMEM-resident)
      wl_ref: (Lout, Lk)      final length-Linear weight (torch layout, resident)
      bl_ref: (Lout, 1)
      o_ref : (1, Lout, D)    wrapper swaps (Lout, D) -> (D, Lout)
    """
    D, H = d_model, n_head
    Lk = k_ref.shape[1]

    q_in = q_ref[0]                                    # (Lq, D)
    k_in = k_ref[0]                                    # (Lk, D)
    v_in = v_ref[0]                                    # (Lq, D)  (value len == query len)

    # Lane-dense projections for ALL heads at once: (L, D) @ (D, H*D), f32 accumulate.
    qh_all = jnp.dot(q_in, w_ref[0], preferred_element_type=jnp.float32) + b_ref[0]  # (Lq, H*D)
    kh_all = jnp.dot(k_in, w_ref[1], preferred_element_type=jnp.float32) + b_ref[1]  # (Lk, H*D)
    vh_all = jnp.dot(v_in, w_ref[2], preferred_element_type=jnp.float32) + b_ref[2]  # (Lq, H*D)

    # One XLU transpose for all heads so each per-head score matmul is a plain A @ B.
    qt_all = qh_all.T                                  # (H*D, Lq)

    scale = 1.0 / math.sqrt(d_model)
    acc = jnp.zeros((Lk, D), jnp.float32)              # head-sum stays in registers

    for h in range(H):                                 # static unroll (H is small)
        kh = kh_all[:, h * D:(h + 1) * D]              # (Lk, D)
        qt = qt_all[h * D:(h + 1) * D, :]              # (D, Lq)
        vh = vh_all[:, h * D:(h + 1) * D]              # (Lq, D)

        # scores[k, l] = sum_d kh[k, d] * qh[l, d] / sqrt(d_model)   == 'bhld,bhkd->bhkl'
        scores = jnp.dot(kh, qt, preferred_element_type=jnp.float32) * scale   # (Lk, Lq)

        # softmax over the last (query-length) axis — matches torch softmax(dim=-1).
        m = jnp.max(scores, axis=-1, keepdims=True)
        e = jnp.exp(scores - m)
        inv = pl.reciprocal(jnp.sum(e, axis=-1, keepdims=True), approx=True)   # EUP slot
        attn = e * inv                                 # (Lk, Lq)

        # out_h[k, d] = sum_l attn[k, l] * vh[l, d]   == 'bhkl,bhld->bhkd'
        acc = acc + jnp.dot(attn, vh, preferred_element_type=jnp.float32)

    out_mean = acc * (1.0 / H)                         # (Lk, D)  head mean
    # Final Linear over the length axis: o[o, d] = sum_k Wl[o, k] * out_mean[k, d] + bl[o]
    o = jnp.dot(wl_ref[...], out_mean, preferred_element_type=jnp.float32) + bl_ref[...]
    o_ref[0] = o.astype(o_ref.dtype)                   # (Lout, D)


def cross_attention(query, key, value, params, *, d_model, n_head):
    """query: (B, Lq, D), key: (B, Lk, D), value: (B, Lv, D) with Lv == Lq.

    params (PyTorch layouts):
      Wq, Wk, Wv : (d_model * n_head, d_model)      bq, bk, bv : (d_model * n_head,)
      Wl         : (output_len, input_len)          bl         : (output_len,)
    Returns (B, d_model, output_len) — same as the PyTorch module.
    """
    B, Lq, D = query.shape
    _, Lk, _ = key.shape
    _, Lv, _ = value.shape
    H = n_head
    HD = H * D
    Lout, Lin = params["Wl"].shape
    assert D == d_model and Lv == Lq and Lin == Lk

    # ---- one-time weight layout prep (outside the kernel) ----
    # torch Linear weight (H*D, D) -> x @ W layout (D, H*D); stack all three so the
    # projection weights / biases are a single VMEM-resident block each.
    w_qkv = jnp.stack([params["Wq"].T, params["Wk"].T, params["Wv"].T], axis=0)   # (3, D, H*D)
    b_qkv = jnp.stack([params["bq"].reshape(1, HD),
                       params["bk"].reshape(1, HD),
                       params["bv"].reshape(1, HD)], axis=0)                      # (3, 1, H*D)
    wl = params["Wl"]                        # (Lout, Lk) — used as-is (plain matmul in kernel)
    bl = params["bl"].reshape(Lout, 1)

    kernel = partial(_cross_attention_kernel, d_model=d_model, n_head=n_head)

    batch_blk3 = lambda b: (b, 0, 0)
    fixed_blk3 = lambda b: (0, 0, 0)
    fixed_blk2 = lambda b: (0, 0)

    out = pl.pallas_call(
        kernel,
        out_shape=jax.ShapeDtypeStruct((B, Lout, D), query.dtype),
        grid=(B,),
        in_specs=[
            pl.BlockSpec((1, Lq, D), batch_blk3),     # query
            pl.BlockSpec((1, Lk, D), batch_blk3),     # key
            pl.BlockSpec((1, Lv, D), batch_blk3),     # value
            pl.BlockSpec((3, D, HD), fixed_blk3),     # stacked Wq/Wk/Wv (resident)
            pl.BlockSpec((3, 1, HD), fixed_blk3),     # stacked biases   (resident)
            pl.BlockSpec((Lout, Lk), fixed_blk2),     # Wl
            pl.BlockSpec((Lout, 1), fixed_blk2),      # bl
        ],
        out_specs=pl.BlockSpec((1, Lout, D), batch_blk3),
        compiler_params=pltpu.CompilerParams(
            dimension_semantics=("parallel",),        # batch across cores (v7x megacore)
        ),
    )(query, key, value, w_qkv, b_qkv, wl, bl)

    # Present the module's (b, d_model, output_len) layout (tiny layout swap only).
    return jnp.swapaxes(out, 1, 2)


def _reference(query, key, value, params, *, d_model, n_head):
    """Pure-JAX mirror of the PyTorch forward (eval mode)."""
    B, Lq, D = query.shape
    H = n_head

    def proj(x, w, b):
        y = x @ w.T + b                                          # (B, L, H*D)
        return y.reshape(B, x.shape[1], H, D).transpose(0, 2, 1, 3)  # 'b l (h d) -> b h l d'

    Q = proj(query, params["Wq"], params["bq"])
    K = proj(key, params["Wk"], params["bk"])
    V = proj(value, params["Wv"], params["bv"])
    attn = jnp.einsum("bhld,bhkd->bhkl", Q, K) / math.sqrt(d_model)
    attn = jax.nn.softmax(attn, axis=-1)
    out = jnp.einsum("bhkl,bhld->bhkd", attn, V)                 # (B, H, Lk, D)
    out = out.mean(axis=1)                                       # 'b h l d -> b l d' mean
    out = jnp.swapaxes(out, 1, 2)                                # 'b l d -> b d l'
    out = jnp.einsum("bdk,ok->bdo", out, params["Wl"]) + params["bl"]
    return out


if __name__ == "__main__":
    key0 = jax.random.PRNGKey(0)
    B, d_model, n_head = 2, 32, 4
    Lq = Lv = 16                 # query / value length
    input_len = 8                # key length == Linear input_len
    output_len = 8
    # dropout = 0.0 (eval mode: identity)

    ks = jax.random.split(key0, 12)
    q = jax.random.normal(ks[0], (B, Lq, d_model), dtype=jnp.float32)
    k = jax.random.normal(ks[1], (B, input_len, d_model), dtype=jnp.float32)
    v = jax.random.normal(ks[2], (B, Lv, d_model), dtype=jnp.float32)

    s_in = 1.0 / math.sqrt(d_model)
    s_len = 1.0 / math.sqrt(input_len)
    params = {
        "Wq": jax.random.normal(ks[3], (d_model * n_head, d_model), jnp.float32) * s_in,
        "bq": jax.random.normal(ks[4], (d_model * n_head,), jnp.float32) * s_in,
        "Wk": jax.random.normal(ks[5], (d_model * n_head, d_model), jnp.float32) * s_in,
        "bk": jax.random.normal(ks[6], (d_model * n_head,), jnp.float32) * s_in,
        "Wv": jax.random.normal(ks[7], (d_model * n_head, d_model), jnp.float32) * s_in,
        "bv": jax.random.normal(ks[8], (d_model * n_head,), jnp.float32) * s_in,
        "Wl": jax.random.normal(ks[9], (output_len, input_len), jnp.float32) * s_len,
        "bl": jax.random.normal(ks[10], (output_len,), jnp.float32) * s_len,
    }

    y = cross_attention(q, k, v, params, d_model=d_model, n_head=n_head)
    y = jax.block_until_ready(y)

    y_ref = _reference(q, k, v, params, d_model=d_model, n_head=n_head)
    assert y.shape == y_ref.shape == (B, d_model, output_len), (y.shape, y_ref.shape)
    max_err = float(jnp.max(jnp.abs(y - y_ref)))
    assert jnp.allclose(y, y_ref, atol=2e-3, rtol=2e-3), f"max abs err = {max_err}"

    print("KERNEL_OK")
</pallas_src>

<mosaic_0001>
module attributes {stable_mosaic.version = 11 : i64} {
  func.func @_cross_attention_kernel(%arg0: i32, %arg1: memref<1x16x32xf32, #tpu.memory_space<vmem>>, %arg2: memref<1x8x32xf32, #tpu.memory_space<vmem>>, %arg3: memref<1x16x32xf32, #tpu.memory_space<vmem>>, %arg4: memref<3x32x128xf32, #tpu.memory_space<vmem>>, %arg5: memref<3x1x128xf32, #tpu.memory_space<vmem>>, %arg6: memref<8x8xf32, #tpu.memory_space<vmem>>, %arg7: memref<8x1xf32, #tpu.memory_space<vmem>>, %arg8: memref<1x8x32xf32, #tpu.memory_space<vmem>>) attributes {dimension_semantics = [#tpu.dimension_semantics<parallel>], iteration_bounds = array<i64: 2>, scalar_prefetch = 0 : i64, scratch_operands = 0 : i64, tpu.core_type = #tpu.core_type<tc>, window_params = [{transform_indices = @transform_0, window_bounds = array<i64: 1, 16, 32>}, {transform_indices = @transform_1, window_bounds = array<i64: 1, 8, 32>}, {transform_indices = @transform_2, window_bounds = array<i64: 1, 16, 32>}, {pipeline_mode = #tpu.pipeline_mode<synchronous>, transform_indices = @transform_3, window_bounds = array<i64: 3, 32, 128>}, {pipeline_mode = #tpu.pipeline_mode<synchronous>, transform_indices = @transform_4, window_bounds = array<i64: 3, 1, 128>}, {pipeline_mode = #tpu.pipeline_mode<synchronous>, transform_indices = @transform_5, window_bounds = array<i64: 8, 8>}, {pipeline_mode = #tpu.pipeline_mode<synchronous>, transform_indices = @transform_6, window_bounds = array<i64: 8, 1>}, {transform_indices = @transform_7, window_bounds = array<i64: 1, 8, 32>}]} {
    %c0 = arith.constant 0 : index
    %c0_0 = arith.constant 0 : index
    %c0_1 = arith.constant 0 : index
    %0 = vector.load %arg1[%c0, %c0_0, %c0_1] : memref<1x16x32xf32, #tpu.memory_space<vmem>>, vector<1x16x32xf32>
    %1 = vector.shape_cast %0 : vector<1x16x32xf32> to vector<16x32xf32>
    %c0_2 = arith.constant 0 : index
    %c0_3 = arith.constant 0 : index
    %c0_4 = arith.constant 0 : index
    %2 = vector.load %arg2[%c0_2, %c0_3, %c0_4] : memref<1x8x32xf32, #tpu.memory_space<vmem>>, vector<1x8x32xf32>
    %3 = vector.shape_cast %2 : vector<1x8x32xf32> to vector<8x32xf32>
    %c0_5 = arith.constant 0 : index
    %c0_6 = arith.constant 0 : index
    %c0_7 = arith.constant 0 : index
    %4 = vector.load %arg3[%c0_5, %c0_6, %c0_7] : memref<1x16x32xf32, #tpu.memory_space<vmem>>, vector<1x16x32xf32>
    %5 = vector.shape_cast %4 : vector<1x16x32xf32> to vector<16x32xf32>
    %c0_8 = arith.constant 0 : index
    %c0_9 = arith.constant 0 : index
    %c0_10 = arith.constant 0 : index
    %6 = vector.load %arg4[%c0_8, %c0_9, %c0_10] : memref<3x32x128xf32, #tpu.memory_space<vmem>>, vector<1x32x128xf32>
    %7 = vector.shape_cast %6 : vector<1x32x128xf32> to vector<32x128xf32>
    %cst = arith.constant dense<0.000000e+00> : vector<16x128xf32>
    %8 = tpu.matmul %1, %7, %cst {dimension_numbers = #tpu.dot_dimension_numbers<[1], [0], [0], [1], [0, 0, 1, 1], [], []>} : vector<16x32xf32>, vector<32x128xf32>, vector<16x128xf32> -> vector<16x128xf32>
    %c0_11 = arith.constant 0 : index
    %c0_12 = arith.constant 0 : index
    %c0_13 = arith.constant 0 : index
    %9 = vector.load %arg5[%c0_11, %c0_12, %c0_13] : memref<3x1x128xf32, #tpu.memory_space<vmem>>, vector<1x1x128xf32>
    %10 = vector.shape_cast %9 : vector<1x1x128xf32> to vector<1x128xf32>
    %11 = vector.broadcast %10 : vector<1x128xf32> to vector<16x128xf32>
    %12 = arith.addf %8, %11 : vector<16x128xf32>
    %c1 = arith.constant 1 : index
    %c0_14 = arith.constant 0 : index
    %c0_15 = arith.constant 0 : index
    %13 = vector.load %arg4[%c1, %c0_14, %c0_15] : memref<3x32x128xf32, #tpu.memory_space<vmem>>, vector<1x32x128xf32>
    %14 = vector.shape_cast %13 : vector<1x32x128xf32> to vector<32x128xf32>
    %cst_16 = arith.constant dense<0.000000e+00> : vector<8x128xf32>
    %15 = tpu.matmul %3, %14, %cst_16 {dimension_numbers = #tpu.dot_dimension_numbers<[1], [0], [0], [1], [0, 0, 1, 1], [], []>} : vector<8x32xf32>, vector<32x128xf32>, vector<8x128xf32> -> vector<8x128xf32>
    %c1_17 = arith.constant 1 : index
    %c0_18 = arith.constant 0 : index
    %c0_19 = arith.constant 0 : index
    %16 = vector.load %arg5[%c1_17, %c0_18, %c0_19] : memref<3x1x128xf32, #tpu.memory_space<vmem>>, vector<1x1x128xf32>
    %17 = vector.shape_cast %16 : vector<1x1x128xf32> to vector<1x128xf32>
    %18 = vector.broadcast %17 : vector<1x128xf32> to vector<8x128xf32>
    %19 = arith.addf %15, %18 : vector<8x128xf32>
    %c2 = arith.constant 2 : index
    %c0_20 = arith.constant 0 : index
    %c0_21 = arith.constant 0 : index
    %20 = vector.load %arg4[%c2, %c0_20, %c0_21] : memref<3x32x128xf32, #tpu.memory_space<vmem>>, vector<1x32x128xf32>
    %21 = vector.shape_cast %20 : vector<1x32x128xf32> to vector<32x128xf32>
    %cst_22 = arith.constant dense<0.000000e+00> : vector<16x128xf32>
    %22 = tpu.matmul %5, %21, %cst_22 {dimension_numbers = #tpu.dot_dimension_numbers<[1], [0], [0], [1], [0, 0, 1, 1], [], []>} : vector<16x32xf32>, vector<32x128xf32>, vector<16x128xf32> -> vector<16x128xf32>
    %c2_23 = arith.constant 2 : index
    %c0_24 = arith.constant 0 : index
    %c0_25 = arith.constant 0 : index
    %23 = vector.load %arg5[%c2_23, %c0_24, %c0_25] : memref<3x1x128xf32, #tpu.memory_space<vmem>>, vector<1x1x128xf32>
    %24 = vector.shape_cast %23 : vector<1x1x128xf32> to vector<1x128xf32>
    %25 = vector.broadcast %24 : vector<1x128xf32> to vector<16x128xf32>
    %26 = arith.addf %22, %25 : vector<16x128xf32>
    %27 = tpu.transpose %12, [1, 0] : vector<16x128xf32> -> vector<128x16xf32>
    %cst_26 = arith.constant 0.000000e+00 : f32
    %28 = vector.broadcast %cst_26 : f32 to vector<8x32xf32>
    %29 = vector.extract_strided_slice %19 {offsets = [0, 0], sizes = [8, 32], strides = [1, 1]} : vector<8x128xf32> to vector<8x32xf32>
    %30 = vector.extract_strided_slice %27 {offsets = [0, 0], sizes = [32, 16], strides = [1, 1]} : vector<128x16xf32> to vector<32x16xf32>
    %31 = vector.extract_strided_slice %26 {offsets = [0, 0], sizes = [16, 32], strides = [1, 1]} : vector<16x128xf32> to vector<16x32xf32>
    %cst_27 = arith.constant dense<0.000000e+00> : vector<8x16xf32>
    %32 = tpu.matmul %29, %30, %cst_27 {dimension_numbers = #tpu.dot_dimension_numbers<[1], [0], [0], [1], [0, 0, 1, 1], [], []>} : vector<8x32xf32>, vector<32x16xf32>, vector<8x16xf32> -> vector<8x16xf32>
    %cst_28 = arith.constant 0.176776692 : f32
    %33 = vector.broadcast %cst_28 : f32 to vector<8x16xf32>
    %34 = arith.mulf %32, %33 : vector<8x16xf32>
    %cst_29 = arith.constant dense<0xFF800000> : vector<8xf32>
    %35 = vector.multi_reduction <maximumf>, %34, %cst_29 [1] : vector<8x16xf32> to vector<8xf32>
    %36 = vector.shape_cast %35 : vector<8xf32> to vector<8x1xf32>
    %37 = vector.broadcast %36 : vector<8x1xf32> to vector<8x16xf32>
    %38 = arith.subf %34, %37 : vector<8x16xf32>
    %39 = math.exp %38 : vector<8x16xf32>
    %cst_30 = arith.constant dense<0.000000e+00> : vector<8xf32>
    %40 = vector.multi_reduction <add>, %39, %cst_30 [1] : vector<8x16xf32> to vector<8xf32>
    %41 = vector.shape_cast %40 : vector<8xf32> to vector<8x1xf32>
    %42 = tpu.reciprocal %41 {approx = true} : vector<8x1xf32> -> vector<8x1xf32>
    %43 = vector.broadcast %42 : vector<8x1xf32> to vector<8x16xf32>
    %44 = arith.mulf %39, %43 : vector<8x16xf32>
    %cst_31 = arith.constant dense<0.000000e+00> : vector<8x32xf32>
    %45 = tpu.matmul %44, %31, %cst_31 {dimension_numbers = #tpu.dot_dimension_numbers<[1], [0], [0], [1], [0, 0, 1, 1], [], []>} : vector<8x16xf32>, vector<16x32xf32>, vector<8x32xf32> -> vector<8x32xf32>
    %46 = arith.addf %28, %45 : vector<8x32xf32>
    %47 = vector.extract_strided_slice %19 {offsets = [0, 32], sizes = [8, 32], strides = [1, 1]} : vector<8x128xf32> to vector<8x32xf32>
    %48 = vector.extract_strided_slice %27 {offsets = [32, 0], sizes = [32, 16], strides = [1, 1]} : vector<128x16xf32> to vector<32x16xf32>
    %49 = vector.extract_strided_slice %26 {offsets = [0, 32], sizes = [16, 32], strides = [1, 1]} : vector<16x128xf32> to vector<16x32xf32>
    %cst_32 = arith.constant dense<0.000000e+00> : vector<8x16xf32>
    %50 = tpu.matmul %47, %48, %cst_32 {dimension_numbers = #tpu.dot_dimension_numbers<[1], [0], [0], [1], [0, 0, 1, 1], [], []>} : vector<8x32xf32>, vector<32x16xf32>, vector<8x16xf32> -> vector<8x16xf32>
    %cst_33 = arith.constant 0.176776692 : f32
    %51 = vector.broadcast %cst_33 : f32 to vector<8x16xf32>
    %52 = arith.mulf %50, %51 : vector<8x16xf32>
    %cst_34 = arith.constant dense<0xFF800000> : vector<8xf32>
    %53 = vector.multi_reduction <maximumf>, %52, %cst_34 [1] : vector<8x16xf32> to vector<8xf32>
    %54 = vector.shape_cast %53 : vector<8xf32> to vector<8x1xf32>
    %55 = vector.broadcast %54 : vector<8x1xf32> to vector<8x16xf32>
    %56 = arith.subf %52, %55 : vector<8x16xf32>
    %57 = math.exp %56 : vector<8x16xf32>
    %cst_35 = arith.constant dense<0.000000e+00> : vector<8xf32>
    %58 = vector.multi_reduction <add>, %57, %cst_35 [1] : vector<8x16xf32> to vector<8xf32>
    %59 = vector.shape_cast %58 : vector<8xf32> to vector<8x1xf32>
    %60 = tpu.reciprocal %59 {approx = true} : vector<8x1xf32> -> vector<8x1xf32>
    %61 = vector.broadcast %60 : vector<8x1xf32> to vector<8x16xf32>
    %62 = arith.mulf %57, %61 : vector<8x16xf32>
    %cst_36 = arith.constant dense<0.000000e+00> : vector<8x32xf32>
    %63 = tpu.matmul %62, %49, %cst_36 {dimension_numbers = #tpu.dot_dimension_numbers<[1], [0], [0], [1], [0, 0, 1, 1], [], []>} : vector<8x16xf32>, vector<16x32xf32>, vector<8x32xf32> -> vector<8x32xf32>
    %64 = arith.addf %46, %63 : vector<8x32xf32>
    %65 = vector.extract_strided_slice %19 {offsets = [0, 64], sizes = [8, 32], strides = [1, 1]} : vector<8x128xf32> to vector<8x32xf32>
    %66 = vector.extract_strided_slice %27 {offsets = [64, 0], sizes = [32, 16], strides = [1, 1]} : vector<128x16xf32> to vector<32x16xf32>
    %67 = vector.extract_strided_slice %26 {offsets = [0, 64], sizes = [16, 32], strides = [1, 1]} : vector<16x128xf32> to vector<16x32xf32>
    %cst_37 = arith.constant dense<0.000000e+00> : vector<8x16xf32>
    %68 = tpu.matmul %65, %66, %cst_37 {dimension_numbers = #tpu.dot_dimension_numbers<[1], [0], [0], [1], [0, 0, 1, 1], [], []>} : vector<8x32xf32>, vector<32x16xf32>, vector<8x16xf32> -> vector<8x16xf32>
    %cst_38 = arith.constant 0.176776692 : f32
    %69 = vector.broadcast %cst_38 : f32 to vector<8x16xf32>
    %70 = arith.mulf %68, %69 : vector<8x16xf32>
    %cst_39 = arith.constant dense<0xFF800000> : vector<8xf32>
    %71 = vector.multi_reduction <maximumf>, %70, %cst_39 [1] : vector<8x16xf32> to vector<8xf32>
    %72 = vector.shape_cast %71 : vector<8xf32> to vector<8x1xf32>
    %73 = vector.broadcast %72 : vector<8x1xf32> to vector<8x16xf32>
    %74 = arith.subf %70, %73 : vector<8x16xf32>
    %75 = math.exp %74 : vector<8x16xf32>
    %cst_40 = arith.constant dense<0.000000e+00> : vector<8xf32>
    %76 = vector.multi_reduction <add>, %75, %cst_40 [1] : vector<8x16xf32> to vector<8xf32>
    %77 = vector.shape_cast %76 : vector<8xf32> to vector<8x1xf32>
    %78 = tpu.reciprocal %77 {approx = true} : vector<8x1xf32> -> vector<8x1xf32>
    %79 = vector.broadcast %78 : vector<8x1xf32> to vector<8x16xf32>
    %80 = arith.mulf %75, %79 : vector<8x16xf32>
    %cst_41 = arith.constant dense<0.000000e+00> : vector<8x32xf32>
    %81 = tpu.matmul %80, %67, %cst_41 {dimension_numbers = #tpu.dot_dimension_numbers<[1], [0], [0], [1], [0, 0, 1, 1], [], []>} : vector<8x16xf32>, vector<16x32xf32>, vector<8x32xf32> -> vector<8x32xf32>
    %82 = arith.addf %64, %81 : vector<8x32xf32>
    %83 = vector.extract_strided_slice %19 {offsets = [0, 96], sizes = [8, 32], strides = [1, 1]} : vector<8x128xf32> to vector<8x32xf32>
    %84 = vector.extract_strided_slice %27 {offsets = [96, 0], sizes = [32, 16], strides = [1, 1]} : vector<128x16xf32> to vector<32x16xf32>
    %85 = vector.extract_strided_slice %26 {offsets = [0, 96], sizes = [16, 32], strides = [1, 1]} : vector<16x128xf32> to vector<16x32xf32>
    %cst_42 = arith.constant dense<0.000000e+00> : vector<8x16xf32>
    %86 = tpu.matmul %83, %84, %cst_42 {dimension_numbers = #tpu.dot_dimension_numbers<[1], [0], [0], [1], [0, 0, 1, 1], [], []>} : vector<8x32xf32>, vector<32x16xf32>, vector<8x16xf32> -> vector<8x16xf32>
    %cst_43 = arith.constant 0.176776692 : f32
    %87 = vector.broadcast %cst_43 : f32 to vector<8x16xf32>
    %88 = arith.mulf %86, %87 : vector<8x16xf32>
    %cst_44 = arith.constant dense<0xFF800000> : vector<8xf32>
    %89 = vector.multi_reduction <maximumf>, %88, %cst_44 [1] : vector<8x16xf32> to vector<8xf32>
    %90 = vector.shape_cast %89 : vector<8xf32> to vector<8x1xf32>
    %91 = vector.broadcast %90 : vector<8x1xf32> to vector<8x16xf32>
    %92 = arith.subf %88, %91 : vector<8x16xf32>
    %93 = math.exp %92 : vector<8x16xf32>
    %cst_45 = arith.constant dense<0.000000e+00> : vector<8xf32>
    %94 = vector.multi_reduction <add>, %93, %cst_45 [1] : vector<8x16xf32> to vector<8xf32>
    %95 = vector.shape_cast %94 : vector<8xf32> to vector<8x1xf32>
    %96 = tpu.reciprocal %95 {approx = true} : vector<8x1xf32> -> vector<8x1xf32>
    %97 = vector.broadcast %96 : vector<8x1xf32> to vector<8x16xf32>
    %98 = arith.mulf %93, %97 : vector<8x16xf32>
    %cst_46 = arith.constant dense<0.000000e+00> : vector<8x32xf32>
    %99 = tpu.matmul %98, %85, %cst_46 {dimension_numbers = #tpu.dot_dimension_numbers<[1], [0], [0], [1], [0, 0, 1, 1], [], []>} : vector<8x16xf32>, vector<16x32xf32>, vector<8x32xf32> -> vector<8x32xf32>
    %100 = arith.addf %82, %99 : vector<8x32xf32>
    %cst_47 = arith.constant 2.500000e-01 : f32
    %101 = vector.broadcast %cst_47 : f32 to vector<8x32xf32>
    %102 = arith.mulf %100, %101 : vector<8x32xf32>
    %c0_48 = arith.constant 0 : index
    %c0_49 = arith.constant 0 : index
    %103 = vector.load %arg6[%c0_48, %c0_49] : memref<8x8xf32, #tpu.memory_space<vmem>>, vector<8x8xf32>
    %cst_50 = arith.constant dense<0.000000e+00> : vector<8x32xf32>
    %104 = tpu.matmul %103, %102, %cst_50 {dimension_numbers = #tpu.dot_dimension_numbers<[1], [0], [0], [1], [0, 0, 1, 1], [], []>} : vector<8x8xf32>, vector<8x32xf32>, vector<8x32xf32> -> vector<8x32xf32>
    %c0_51 = arith.constant 0 : index
    %c0_52 = arith.constant 0 : index
    %105 = vector.load %arg7[%c0_51, %c0_52] : memref<8x1xf32, #tpu.memory_space<vmem>>, vector<8x1xf32>
    %106 = vector.broadcast %105 : vector<8x1xf32> to vector<8x32xf32>
    %107 = arith.addf %104, %106 : vector<8x32xf32>
    %c0_53 = arith.constant 0 : index
    %c0_54 = arith.constant 0 : index
    %c0_55 = arith.constant 0 : index
    %108 = vector.load %arg8[%c0_53, %c0_54, %c0_55] : memref<1x8x32xf32, #tpu.memory_space<vmem>>, vector<1x8x32xf32>
    %109 = vector.shape_cast %108 : vector<1x8x32xf32> to vector<8x32xf32>
    %110 = vector.shape_cast %107 : vector<8x32xf32> to vector<1x8x32xf32>
    tpu.vector_store %arg8[%c0_53, %c0_54, %c0_55], %110 {strides = array<i32>} : memref<1x8x32xf32, #tpu.memory_space<vmem>>, vector<1x8x32xf32>,
    return
  }
  func.func @transform_0(%arg0: i32) -> (i32, i32, i32) {
    %c0_i32 = arith.constant 0 : i32
    %c0_i32_0 = arith.constant 0 : i32
    %c0_i32_1 = arith.constant 0 : i32
    return %arg0, %c0_i32, %c0_i32_0 : i32, i32, i32
  }
  func.func @transform_1(%arg0: i32) -> (i32, i32, i32) {
    %c0_i32 = arith.constant 0 : i32
    %c0_i32_0 = arith.constant 0 : i32
    %c0_i32_1 = arith.constant 0 : i32
    return %arg0, %c0_i32, %c0_i32_0 : i32, i32, i32
  }
  func.func @transform_2(%arg0: i32) -> (i32, i32, i32) {
    %c0_i32 = arith.constant 0 : i32
    %c0_i32_0 = arith.constant 0 : i32
    %c0_i32_1 = arith.constant 0 : i32
    return %arg0, %c0_i32, %c0_i32_0 : i32, i32, i32
  }
  func.func @transform_3(%arg0: i32) -> (i32, i32, i32) {
    %c0_i32 = arith.constant 0 : i32
    %c0_i32_0 = arith.constant 0 : i32
    %c0_i32_1 = arith.constant 0 : i32
    %c0_i32_2 = arith.constant 0 : i32
    return %c0_i32, %c0_i32_0, %c0_i32_1 : i32, i32, i32
  }
  func.func @transform_4(%arg0: i32) -> (i32, i32, i32) {
    %c0_i32 = arith.constant 0 : i32
    %c0_i32_0 = arith.constant 0 : i32
    %c0_i32_1 = arith.constant 0 : i32
    %c0_i32_2 = arith.constant 0 : i32
    return %c0_i32, %c0_i32_0, %c0_i32_1 : i32, i32, i32
  }
  func.func @transform_5(%arg0: i32) -> (i32, i32) {
    %c0_i32 = arith.constant 0 : i32
    %c0_i32_0 = arith.constant 0 : i32
    %c0_i32_1 = arith.constant 0 : i32
    return %c0_i32, %c0_i32_0 : i32, i32
  }
  func.func @transform_6(%arg0: i32) -> (i32, i32) {
    %c0_i32 = arith.constant 0 : i32
    %c0_i32_0 = arith.constant 0 : i32
    %c0_i32_1 = arith.constant 0 : i32
    return %c0_i32, %c0_i32_0 : i32, i32
  }
  func.func @transform_7(%arg0: i32) -> (i32, i32, i32) {
    %c0_i32 = arith.constant 0 : i32
    %c0_i32_0 = arith.constant 0 : i32
    %c0_i32_1 = arith.constant 0 : i32
    return %arg0, %c0_i32, %c0_i32_0 : i32, i32, i32
  }
}

</mosaic_0001>

<bundles_post_ra>
// kernel: tpu_custom_call.1
= control target key start
LH: loop header
LB: loop body
LE: loop exit
PB: predicated region body
PF: predicated region fallthrough
CT: control target
= control target key end

     0   :  { %s2492_s0 = inlined_call_operand.hbm [shape: f32[2,16,32], index: 0, kind: input, shape index: {}]   ;;  %s2493_s1 = inlined_call_operand.hbm [shape: f32[2,8,32], index: 1, kind: input, shape index: {}]   ;;  %s2494_s2 = inlined_call_operand.hbm [shape: f32[2,16,32], index: 2, kind: input, shape index: {}]   ;;  %s2495_s3 = inlined_call_operand.hbm [shape: f32[3,32,128], index: 3, kind: input, shape index: {}]   ;;  %s2496_s4 = inlined_call_operand.vmem [shape: f32[3,1,128], index: 4, kind: input, shape index: {}]   ;;  %s2497_s5 = inlined_call_operand.vmem [shape: f32[8,8], index: 5, kind: input, shape index: {}]   ;;  %s2498_s6 = inlined_call_operand.vmem [shape: f32[8,1], index: 6, kind: input, shape index: {}]   ;;  %s2499_s7 = inlined_call_operand.hbm [shape: f32[2,8,32], index: 7, kind: output, shape index: {}]  }
   0x1   :  { %2515 = sst [smem:[#allocation22_spill]] %s2493_s1 }
   0x2   :  { %2516 = sst [smem:[#allocation23_spill]] %s2499_s7 }
   0x3   :  { %12 = vsyncpa [#allocation3], 0 }
   0x4   :  { %14 = vsyncpa [#allocation3 + $0x1], 0 }
   0x5   :  { %15 = vsyncpa [#allocation6], 0 }
   0x6   :  { %17 = vsyncpa [#allocation6 + $0x1], 0 }
   0x7   :  { %18 = vsyncpa [#allocation9], 0 }
   0x8   :  { %19 = vsyncpa [#allocation4], 0 }
   0x9   :  { %21 = vsyncpa [#allocation4 + $0x1], 0  ;;  %s2090_s24 = smov 0   ;;  %s2092_s25 = smov 0  }
   0xa   :  { %s2094_s26 = smov 0   ;;  %s2096_s27 = smov 0  }
   0xb LB: > { %2517 = sst [smem:[#allocation15_spill]] %s2023_s24  ;;  %s2111_s28 = sadd.s32 1, %s2035_s27   ;;  %s2035_s27 = sphi %s2096_s27, %s2546_s27   ;;  %s2031_s26 = sphi %s2094_s26, %s2548_s26   ;;  %s2027_s25 = sphi %s2092_s25, %s2550_s25   ;;  %s2023_s24 = sphi %s2090_s24, %s2549_s24  }
   0xc   : > { %2518 = sst [smem:[#allocation16_spill]] %s2031_s26  ;;  %s34_s29 = sadd.s32 1, %s2031_s26 }
   0xd   : > { %2519 = sst [smem:[#allocation17_spill]] %s2035_s27  ;;  %s31_s30 = ssub.s32 %s2035_s27, %s2111_s28 }
   0xe   : > { %2520 = sst [smem:[#allocation18_spill]] %s2111_s28  ;;  %p2500_p0 = scmp.ne.s32.totalorder %s2031_s26, %s2027_s25 }
   0xf   : > { %p32_p1 = scmp.eq.s32.totalorder %s31_s30, 0  ;;  %p42_p2 = scmp.eq.s32.totalorder %s2035_s27, 0 }
  0x10   : > { %p1791_p4 = scmp.lt.s32.totalorder %s2035_s27, 2  ;;  %s2128_s9 = sand.u32 1, %s2031_s26  }
  0x11   : > { %s2122_s8 = scalar_select %p32_p1, %s2031_s26, %s34_s29  }
  0x12   : > { %p43_p5 = por %p42_p2, %p2500_p0  ;;  %s2501_s10 = sshll.u32 %s2128_s9, 4 }
  0x13   : > { %2521 = sst [smem:[#allocation19_spill]] %s2122_s8  ;;  %s276_s11 = sand.u32 1, %s2035_s27  }
  0x14   : > { %p2132_p6 = pnand %p1791_p4, %p43_p5  ;;  %s1579_s13 = sshll.u32 %s2128_s9, 3 }
  0x15   : > { %s1580_s14 = sshll.u32 %s2035_s27, 7  ;;  %s2523_s1 = sld [smem:[#allocation22_spill]] }
  0x16   : > { %s280_s18 = scalar_lea.vmem [#allocation5], %s1579_s13  ;;  %s2143_s20 = scalar_lea.sflag [#allocation6], %s276_s11 }
  0x17   : > { %s287_s19 = sshll.u32 %s280_s18, 4  ;;  %p2149_p8 = pneg %p2132_p6  ;;  %s288_s19 = int_to_ptr.vmem [resolvable:$true] %s287_s19 }
  0x1b   : > { %s2141_s17 = scalar_lea.hbm %s2523_s1, %s1580_s14  ;;  %s1858_s30 = scalar_lea.hbm %s2523_s1, 256 }
  0x1c   : > { %s1853_s21 = scalar_lea.hbm %s2141_s17, 128  ;;  %p1859_p11 = scmp.lt.s32.totalorder %s2141_s17, %s2523_s1 }
  0x1d   : > { %p1854_p7 = scmp.ne.s32.totalorder %s2141_s17, %s1853_s21  ;;  %p1860_p12 = scmp.lt.s32.totalorder %s1858_s30, %s1853_s21 }
  0x1f   : > { %p1856_p9 = pnand %p2149_p8, %p1854_p7  ;;  %p1861_p13 = por %p1860_p12, %p1859_p11 }
  0x21   : > { %p1857_p10 = pneg %p1856_p9 }
  0x23   : > { %p1862_p1 = pnand %p1861_p13, %p1857_p10 }
  0x25   : > { %1865 = shalt.err (!%p1862_p1)
}
  0x26   : > { %s1866_s11 = scalar_lea.vmem %s288_s19, 128  ;;  %s2037_s15 = smov [#allocation5]  }
  0x27   : > { %p1867_p2 = scmp.ne.s32.totalorder %s288_s19, %s1866_s11  ;;  %s1871_s16 = sshll.u32 %s2037_s15, 4  ;;  %s1872_s16 = int_to_ptr.vmem [resolvable:$false] %s1871_s16 }
  0x28   : > { %s1873_s18 = scalar_lea.vmem %s1872_s16, 256  ;;  %p1874_p7 = scmp.lt.s32.totalorder %s288_s19, %s1872_s16 }
  0x29   : > { %p1869_p4 = pnand %p1867_p2, %p2149_p8  ;;  %p1875_p9 = scmp.lt.s32.totalorder %s1873_s18, %s1866_s11 }
  0x2b   : > { %p1870_p5 = pneg %p1869_p4  ;;  %p1876_p3 = por %p1875_p9, %p1874_p7 }
  0x2d   : > { %p1877_p0 = pnand %p1876_p3, %p1870_p5 }
  0x2f   : > { %1880 = shalt.err (!%p1877_p0)
}
  0x30   : > { %1782 = dma.hbm_to_vmem [thread:$0]  (!%p2132_p6), %s2141_s17, 128, %s288_s19, %s2143_s20  }
  0x31   : > { %s298_s21 = scalar_lea.vmem [#allocation7], %s2501_s10  ;;  %s2173_s29 = sadd.s32 4294967295, %s2035_s27  }
  0x32   : > { %s305_s23 = sshll.u32 %s298_s21, 4  ;;  %s1572_s30 = sadd.s32 4294967294, %s2035_s27   ;;  %s2170_s23 = int_to_ptr.vmem [resolvable:$true] %s305_s23 }
  0x33   : > { %p47_p0 = scmp.ne.s32.totalorder %s2027_s25, %s2023_s24  ;;  %p2507_p3 = scmp.eq.s32.totalorder %s2173_s29, 0 }
  0x34   : > { %p207_p10 = scmp.eq.s32.totalorder %s2173_s29, 1  ;;  %p213_p11 = scmp.eq.s32.totalorder %s1572_s30, 1 }
  0x35   : > { %p2182_p12 = por %p2507_p3, %p47_p0  ;;  %p1573_p13 = scmp.ge.s32.totalorder %s2035_s27, 1 }
  0x36   : > { %p2526_p1 = scmp.ne.s32.totalorder %s2031_s26, %s2027_s25  ;;  %p2194_p4 = por %p213_p11, %p47_p0 }
  0x37   : > { %s2525_s17 = scalar_select %p2182_p12, 1, 0 }
  0x38   : > { %p2190_p2 = por %p207_p10, %p2526_p1  ;;  %p220_p5 = scmp.lt.s32.totalorder %s2035_s27, 3 }
  0x39   : > { %s2529_s13 = scalar_select %p2194_p4, 1, 0 }
  0x3a   : > { %s2527_s19 = scalar_select %p2190_p2, 1, 0 }
  0x3b   : > { %2530 = sst [smem:[#allocation21_spill]] %s2529_s13  ;;  %p2199_p7 = pnand %p1573_p13, %p220_p5 }
  0x3c   : > { %2528 = sst [smem:[#allocation20_spill]] %s2527_s19  ;;  %s2038_s11 = smov [#allocation8]  }
  0x3d   : > { %s2531_s14 = scalar_select %p2199_p7, 1, 0 }
  0x3e   : > { %s232_s15 = sshll.u32 %s2038_s11, 4  ;;  %p1772_p9 = pneg %p2199_p7  ;;  %s233_s15 = int_to_ptr.vmem [resolvable:$true] %s232_s15 }
  0x3f   : > { %s1621_s16 = sshll.u32 %s2035_s27, 8  ;;  %s2533_s1 = sshll.u32 %s2128_s9, 4 }
  0x40   : > { %p2208_p10 = pnand %p1772_p9, %p2507_p3  ;;  %s2215_s10 = scalar_lea.hbm %s2492_s0, %s1621_s16 }
  0x41   : > { %s259_s8 = scalar_lea.vmem [#allocation2], %s2533_s1  ;;  %s2222_s13 = scalar_lea.hbm %s2494_s2, %s1621_s16 }
  0x42   : > { %s266_s26 = sshll.u32 %s259_s8, 4  ;;  %p1883_p0 = pneg %p2208_p10  ;;  %s2224_s26 = int_to_ptr.vmem [resolvable:$true] %s266_s26 }
  0x43   : > { %s1892_s27 = scalar_lea.vmem %s233_s15, 1536  ;;  %p1900_p5 = scmp.lt.s32.totalorder %s233_s15, %s233_s15 }
  0x44   : > { %p1893_p11 = scmp.ne.s32.totalorder %s233_s15, %s1892_s27  ;;  %p1901_p9 = scmp.lt.s32.totalorder %s1892_s27, %s1892_s27 }
  0x46   : > { %p1895_p13 = pnand %p1893_p11, %p1883_p0  ;;  %p1902_p3 = por %p1901_p9, %p1900_p5 }
  0x48   : > { %p1896_p1 = pneg %p1895_p13 }
  0x4a   : > { %p1903_p4 = pnand %p1902_p3, %p1896_p1 }
  0x4c   : > { %1906 = shalt.err (!%p1903_p4)
}
  0x4d   : > { %s2039_s1 = smov 128   ;;  %s2040_s28 = smov 8  }
  0x4e   : > { %1775 = dma.hbm_to_vmem [thread:$0]  (!%p2208_p10), %s2495_s3, 1536, %s233_s15, [#allocation9], %s2039_s1, %s2039_s1, %s2040_s28  }
  0x4f   : > { %s256_s27 = scalar_lea.sflag [#allocation3], %s2128_s9  ;;  %s1907_s21 = scalar_lea.hbm %s2215_s10, 256 }
  0x50   : > { %p1908_p3 = scmp.ne.s32.totalorder %s2215_s10, %s1907_s21  ;;  %s1912_s24 = scalar_lea.hbm %s2492_s0, 512 }
  0x51   : > { %p1913_p11 = scmp.lt.s32.totalorder %s2215_s10, %s2492_s0  ;;  %p1914_p13 = scmp.lt.s32.totalorder %s1912_s24, %s1907_s21 }
  0x52   : > { %p1910_p4 = pnand %p1908_p3, %p2149_p8 }
  0x53   : > { %p1915_p1 = por %p1914_p13, %p1913_p11 }
  0x54   : > { %p1911_p0 = pneg %p1910_p4 }
  0x56   : > { %p1916_p5 = pnand %p1915_p1, %p1911_p0 }
  0x58   : > { %1919 = shalt.err (!%p1916_p5)
}
  0x59   : > { %s1920_s9 = scalar_lea.vmem %s2224_s26, 256  ;;  %s2041_s15 = smov [#allocation2]  }
  0x5a   : > { %p1921_p10 = scmp.ne.s32.totalorder %s2224_s26, %s1920_s9  ;;  %s1925_s18 = sshll.u32 %s2041_s15, 4  ;;  %s1926_s18 = int_to_ptr.vmem [resolvable:$false] %s1925_s18 }
  0x5b   : > { %s1927_s8 = scalar_lea.vmem %s1926_s18, 512  ;;  %p1928_p4 = scmp.lt.s32.totalorder %s2224_s26, %s1926_s18 }
  0x5c   : > { %p1923_p9 = pnand %p1921_p10, %p2149_p8  ;;  %p1929_p2 = scmp.lt.s32.totalorder %s1927_s8, %s1920_s9 }
  0x5e   : > { %p1924_p3 = pneg %p1923_p9  ;;  %p1930_p12 = por %p1929_p2, %p1928_p4 }
  0x60   : > { %p1931_p7 = pnand %p1930_p12, %p1924_p3 }
  0x62   : > { %1934 = shalt.err (!%p1931_p7)
}
  0x63   : > { %1779 = dma.hbm_to_vmem [thread:$0]  (!%p2132_p6), %s2215_s10, 256, %s2224_s26, %s256_s27, %s2039_s1, %s2039_s1, %s2040_s28  }
  0x64   : > { %s1935_s7 = scalar_lea.hbm %s2222_s13, 256  ;;  %s1940_s16 = scalar_lea.hbm %s2494_s2, 512 }
  0x65   : > { %p1936_p0 = scmp.ne.s32.totalorder %s2222_s13, %s1935_s7  ;;  %p1941_p12 = scmp.lt.s32.totalorder %s2222_s13, %s2494_s2 }
  0x66   : > { %p1942_p2 = scmp.lt.s32.totalorder %s1940_s16, %s1935_s7 }
  0x67   : > { %p1938_p11 = pnand %p1936_p0, %p2149_p8 }
  0x68   : > { %p1943_p7 = por %p1942_p2, %p1941_p12 }
  0x69   : > { %p1939_p13 = pneg %p1938_p11 }
  0x6b   : > { %p1944_p1 = pnand %p1943_p7, %p1939_p13 }
  0x6d   : > { %1947 = shalt.err (!%p1944_p1)
}
  0x6e   : > { %s1948_s26 = scalar_lea.vmem %s2170_s23, 256  ;;  %s2042_s10 = smov [#allocation7]  }
  0x6f   : > { %p1949_p5 = scmp.ne.s32.totalorder %s2170_s23, %s1948_s26  ;;  %s1953_s27 = sshll.u32 %s2042_s10, 4  ;;  %s1954_s27 = int_to_ptr.vmem [resolvable:$false] %s1953_s27 }
  0x70   : > { %s1955_s11 = scalar_lea.vmem %s1954_s27, 512  ;;  %p1956_p3 = scmp.lt.s32.totalorder %s2170_s23, %s1954_s27 }
  0x71   : > { %p1951_p10 = pnand %p1949_p5, %p2149_p8  ;;  %p1957_p4 = scmp.lt.s32.totalorder %s1955_s11, %s1948_s26 }
  0x73   : > { %p1952_p9 = pneg %p1951_p10  ;;  %p1958_p0 = por %p1957_p4, %p1956_p3 }
  0x75   : > { %p1959_p11 = pnand %p1958_p0, %p1952_p9 }
  0x77   : > { %1962 = shalt.err (!%p1959_p11)
}
  0x78   : > { %1785 = dma.hbm_to_vmem [thread:$0]  (!%p2132_p6), %s2222_s13, 256, %s2170_s23, %s2143_s20, %s2039_s1, %s2039_s1, %s2040_s28  }
  0x79   : > { %p2534_p8 = scmp.ne.s32.totalorder %s2531_s14, 0 }
  0x7a   : > { %s2287_s22 = sand.u32 (!%p2534_p8), 1, %s2027_s25   ;;  %p2535_p13 = scmp.ne.s32.totalorder (!%p2534_p8), %s2525_s17, 0 }
  0x7b   : > { %317 = sbr.rel (%p2534_p8) target bundleno = 1943 (0x797), region = 48  ;;  %s1585_s9 = sshll.u32 (!%p2534_p8), %s2287_s22, 4 }
  0x7c   : > { %s320_s15 = scalar_lea.sflag (!%p2534_p8), [#allocation3], %s2287_s22  ;;  %s2291_s18 = scalar_lea.vmem (!%p2534_p8), [#allocation2], %s1585_s9 }
  0x80   : > { %2006 = dma.done.wait (%p2535_p13), %s320_s15, 256  }
  0x81   : > { %2008 = vsyncadd (%p2535_p13), %s320_s15, 4294967040  ;;  %s328_s12 = sand.u32 1, %s2173_s29   ;;  %s1586_s20 = sshll.u32 %s2287_s22, 3 }
  0x82   : > { %s329_s23 = scalar_lea.sflag [#allocation6], %s328_s12  ;;  %s2301_s13 = scalar_lea.vmem [#allocation5], %s1586_s20 }
  0x83   : > { %2010 = dma.done.wait (%p2535_p13), %s329_s23, 384  }
  0x84   : > { %2012 = vsyncadd (%p2535_p13), %s329_s23, 4294966912  ;;  %s2307_s14 = scalar_lea.vmem [#allocation7], %s1585_s9  ;;  %p2536_p6 = scmp.eq.s32.totalorder %s2173_s29, 0 }
  0x86   : > { %2014 = dma.done.wait (%p2536_p6), [#allocation9], 1536   ;;  %p2537_p12 = pmov %p2536_p6 }
  0x87   : > { %v2043_v0 = vmov 0.0   ;;  %vm2044_vm0 = vmmov 0   ;;  %v394_v1 = vld [vmem:[#allocation8 + $0x18] sm:$0xff]  ;;  %v393_v3 = vld [vmem:[#allocation8 + $0x10] sm:$0xff]  ;;  %v392_v5 = vld [vmem:[#allocation8 + $0x8] sm:$0xff]  ;;  %vm402_vm1 = vcmask 261120  }
  0x88   : > { %2016 = vsyncadd (%p2537_p12), [#allocation9], 4294965760  ;;  %1677 = vmatprep.subr.mxu1 %v2043_v0  ;;  %1685 = vmatprep.mubr.msk.f32.mxu1 %vm2044_vm0, %v2043_v0  ;;  %v488_v2 = vld [vmem:[#allocation8 + $0x38] sm:$0xff]  ;;  %v487_v4 = vld [vmem:[#allocation8 + $0x30] sm:$0xff]  ;;  %s2045_s7 = smov 96   ;;  %s2046_s24 = smov 64  }
  0x89   : > { %1666 = vmatprep.subr.mxu0 %v394_v1  ;;  %1678 = vmatpush3.msra.mxu1 %v488_v2  ;;  %v486_v6 = vld [vmem:[#allocation8 + $0x28] sm:$0xff]  ;;  %v391_v7 = vld [vmem:[#allocation8] sm:$0xff]  ;;  %v388_v10 = vld [vmem:[%s2301_s13] sm:$0xff]  ;;  %vm744_vm2 = vcmask 130048   ;;  %s2047_s21 = smov 32   ;;  %vm1360_vm3 = vcmask 64512  }
  0x8a   : > { %1667 = vmatpush3.msra.mxu0 %v394_v1  ;;  %1679 = vmatprep.subr.mxu1 %v2043_v0  ;;  %v485_v8 = vld [vmem:[#allocation8 + $0x20] sm:$0xff]  ;;  %v387_v11 = vld [vmem:[%s2291_s18 + $0x8] sm:$0xff]  ;;  %v573_v13 = vld [vmem:[#allocation8 + $0x50] sm:$0xff]  ;;  %s2538_s11 = sld [smem:[#allocation20_spill]]  ;;  %s1618_s9 = sshll.u32 %s2173_s29, 7 }
  0x8b   : > { %1668 = vmatprep.subr.mxu0 %v393_v3  ;;  %1680 = vmatpush3.msra.mxu1 %v487_v4  ;;  %v386_v9 = vld [vmem:[%s2291_s18] sm:$0xff]  ;;  %v574_v12 = vld [vmem:[#allocation8 + $0x58] sm:$0xff]  ;;  %v389_v14 = vld [vmem:[%s2307_s14] sm:$0xff]  ;;  %s385_s15 = scalar_lea.vmem [#allocation10], %s1586_s20  ;;  %s2539_s13 = sld [smem:[#allocation23_spill]] }
  0x8c   : > { %1669 = vmatpush3.msra.mxu0 %v393_v3  ;;  %1681 = vmatprep.subr.mxu1 %v2043_v0  ;;  %v572_v15 = vld [vmem:[#allocation8 + $0x48] sm:$0xff]  ;;  %v571_v16 = vld [vmem:[#allocation8 + $0x40] sm:$0xff]  ;;  %v1594_v18 = vld [vmem:[%s2496_s4 + $0x1] ss:$0 sm:$0xff]  ;;  %s1449_s18 = sshll.u32 %s385_s15, 4  ;;  %s1436_s17 = scalar_lea.sflag [#allocation4], %s2287_s22  ;;  %s1450_s18 = int_to_ptr.vmem [resolvable:$true] %s1449_s18 }
  0x8d   : > { %1670 = vmatprep.subr.mxu0 %v392_v5  ;;  %1682 = vmatpush3.msra.mxu1 %v486_v6  ;;  %v390_v17 = vld [vmem:[%s2307_s14 + $0x8] sm:$0xff]  ;;  %v1590_v19 = vld [vmem:[%s2496_s4] ss:$0 sm:$0xff]  ;;  %v1597_v37 = vld [vmem:[%s2496_s4 + $0x2] ss:$0 sm:$0xff]  ;;  %s1963_s1 = scalar_lea.vmem %s1450_s18, 128 }
  0x8e   : > { %1671 = vmatpush3.msra.mxu0 %v392_v5  ;;  %1683 = vmatprep.subr.mxu1 %v2043_v0  ;;  %p1964_p2 = scmp.ne.s32.totalorder %s1450_s18, %s1963_s1  ;;  %s2049_s29 = smov [#allocation10]  }
  0x8f   : > { %1672 = vmatprep.subr.mxu0 %v391_v7  ;;  %1684 = vmatpush3.msra.mxu1 %v485_v8  ;;  %s1967_s20 = sshll.u32 %s2049_s29, 4  ;;  %s1968_s20 = int_to_ptr.vmem [resolvable:$false] %s1967_s20 }
  0x90   : > { %1673 = vmatpush3.msra.mxu0 %v391_v7  ;;  %1674 = vmatprep.mubr.msk.f32.mxu0 %vm402_vm1, %v386_v9  ;;  %p2540_p7 = scmp.ne.s32.totalorder %s2538_s11, 0  ;;  %s1969_s28 = scalar_lea.vmem %s1968_s20, 256 }
  0x91   : > { %1686 = vmatmul.mubr.msk.f32.vlgmr.msra.gmra.mxu1 %vm402_vm1, %v388_v10  ;;  %1675 = vmatmul.mubr.msk.f32.vlgmr.msra.gmra.mxu0 %vm402_vm1, %v387_v11  ;;  %s2454_s14 = scalar_lea.hbm %s2539_s13, %s1618_s9  ;;  %p1970_p10 = scmp.lt.s32.totalorder %s1450_s18, %s1968_s20 }
  0x92   : > { %1699 = vmatprep.subr.mxu1 %v2043_v0  ;;  %1703 = vmatprep.mubr.msk.f32.mxu1 %vm2044_vm0, %v2043_v0  ;;  %p1965_p1 = pnand %p1964_p2, %p2540_p7  ;;  %p1971_p9 = scmp.lt.s32.totalorder %s1969_s28, %s1963_s1 }
  0x93   : > { %1688 = vmatprep.subr.mxu0 %v574_v12  ;;  %1696 = vmatprep.mubr.msk.f32.mxu0 %vm402_vm1, %v389_v14 }
  0x94   : > { %1689 = vmatpush3.msra.mxu0 %v574_v12  ;;  %p1966_p5 = pneg %p1965_p1  ;;  %p1972_p3 = por %p1971_p9, %p1970_p10 }
  0x95   : > { %1690 = vmatprep.subr.mxu0 %v573_v13 }
  0x96   : > { %1691 = vmatpush3.msra.mxu0 %v573_v13  ;;  %p1973_p4 = pnand %p1972_p3, %p1966_p5 }
  0x97   : > { %1692 = vmatprep.subr.mxu0 %v572_v15 }
  0x98   : > { %1693 = vmatpush3.msra.mxu0 %v572_v15 }
  0x99   : > { %1694 = vmatprep.subr.mxu0 %v571_v16 }
  0x9a   : > { %1695 = vmatpush3.msra.mxu0 %v571_v16 }
  0x9b   : > { %1706 = vmatprep.subr.mxu0 %v2043_v0  ;;  %1697 = vmatmul.mubr.msk.f32.vlgmr.msra.gmra.mxu0 %vm402_vm1, %v390_v17 }
  0x9c   : > { %1710 = vmatprep.mubr.msk.f32.mxu0 %vm2044_vm0, %v2043_v0 }
 0x151   : > { %v566_v20 = vpop.f32.mrf.mxu1  ;;  %v1676_v21 = vpop.f32.mrf.mxu0 }
 0x152   : > { %v2341_v22 = vadd.f32 %v1594_v18, %v566_v20  ;;  %v2343_v23 = vadd.f32 %v1676_v21, %v1590_v19 }
 0x153   : > { %v475_v24 = vpop.f32.mrf.mxu0  ;;  %v1687_v25 = vpop.f32.mrf.mxu1 }
 0x154   : > { %756 = vrot.lane.b32.xlu1 %v2341_v22, %s2045_s7  ;;  %760 = vrot.lane.b32.xlu0 %v2343_v23, %s2045_s7  ;;  %v2351_v26 = vadd.f32 %v1590_v19, %v475_v24 }
 0x155   : > { %1700 = vmatpush3.xpose.msk.msra.mxu1 %vm402_vm1, %v2343_v23 }
 0x156   : > { %1701 = vmatprep.subr.mxu1 %v2043_v0 }
 0x158   : > { %1008 = vrot.lane.b32.xlu1 %v2343_v23, %s2046_s24  ;;  %758 = vrot.lane.b32.xlu0 %v2351_v26, %s2045_s7 }
 0x159   : > { %1702 = vmatpush3.xpose.msk.msra.mxu1 %vm402_vm1, %v2351_v26 }
 0x15a   : > { %1713 = vmatprep.subr.mxu1 %v2043_v0 }
 0x15b   : > { %v1698_v38 = vpop.f32.mrf.mxu0 }
 0x15c   : > { %1004 = vrot.lane.b32.xlu1 %v2341_v22, %s2046_s24  ;;  %1704 = vmatmul.mubr.msk.f32.vlgmr.msra.gmra.mxu1 %vm402_vm1, %v2341_v22  ;;  %v2387_v39 = vadd.f32 %v1698_v38, %v1597_v37 }
 0x15d   : > { %1006 = vrot.lane.b32.xlu0 %v2351_v26, %s2046_s24  ;;  %1717 = vmatprep.mubr.msk.f32.mxu1 %vm2044_vm0, %v2043_v0  ;;  %v655_v40 = vpop.f32.mrf.mxu0 }
 0x15e   : > { %v2397_v55 = vadd.f32 %v1597_v37, %v655_v40 }
 0x1c6   : > { %v761_v27 = vpop.permute.xlu0 %760  ;;  %v757_v28 = vpop.permute.xlu1 %756 }
 0x1c7   : > { %1707 = vmatpush3.xpose.msk.msra.mxu0 %vm402_vm1, %v761_v27 }
 0x1c8   : > { %1708 = vmatprep.subr.mxu0 %v2043_v0 }
 0x1ca   : > { %v759_v29 = vpop.permute.xlu0 %758  ;;  %v1009_v30 = vpop.permute.xlu1 %1008 }
 0x1cb   : > { %1709 = vmatpush3.xpose.msk.msra.mxu0 %vm402_vm1, %v759_v29 }
 0x1cc   : > { %1727 = vmatprep.subr.mxu0 %v2043_v0 }
 0x1ce   : > { %1711 = vmatmul.mubr.msk.f32.vlgmr.msra.gmra.mxu0 %vm402_vm1, %v757_v28  ;;  %v1005_v32 = vpop.permute.xlu1 %1004 }
 0x1cf   : > { %1728 = vmatpush3.xpose.msk.msra.mxu0 %vm402_vm1, %v1009_v30  ;;  %1731 = vmatprep.mubr.msk.f32.mxu0 %vm2044_vm0, %v2043_v0  ;;  %v1007_v31 = vpop.permute.xlu0 %1006 }
 0x1d0   : > { %1729 = vmatprep.subr.mxu0 %v2043_v0 }
 0x1d3   : > { %1730 = vmatpush3.xpose.msk.msra.mxu0 %vm402_vm1, %v1007_v31 }
 0x1d4   : > { %1748 = vmatprep.subr.mxu0 %v2043_v0 }
 0x1d6   : > { %1732 = vmatmul.mubr.msk.f32.vlgmr.msra.gmra.mxu0 %vm402_vm1, %v1005_v32 }
 0x1d7   : > { %1752 = vmatprep.mubr.msk.f32.mxu0 %vm2044_vm0, %v2043_v0 }
 0x21c   : > { %v739_v33 = vpop.f32.mrf.mxu1 }
 0x21d   : > { %v743_v34 = vmul.f32 0.17677669, %v739_v33 }
 0x21e   : > { %v1705_v35 = vpop.f32.mrf.mxu1 }
 0x21f   : > { %v745_v36 = vsel %vm744_vm2, %v743_v34, -inf }
 0x220   : > { %746 = vmax.xlane.f32.xlu1 %v745_v36 }
 0x231   : > { %854 = vrot.lane.b32.xlu1 %v2387_v39, %s2045_s7 }
 0x28e   : > { %v834_v41 = vpop.f32.mrf.mxu0 }
 0x28f   : > { %v838_v42 = vmul.f32 0.17677669, %v834_v41  ;;  %v2048_v41 = vmov 0  }
 0x290   : > { %v1712_v43 = vpop.f32.mrf.mxu0  ;;  %1835 = vset.pattern.permute.xlu1 %v2048_v41  ;;  %1836 = vset.pattern.permute.xlu0 %v2048_v41 }
 0x291   : > { %v839_v44 = vsel %vm744_vm2, %v838_v42, -inf }
 0x292   : > { %840 = vmax.xlane.f32.xlu0 %v839_v44 }
 0x296   : > { %v1082_v45 = vpop.f32.mrf.mxu0 }
 0x297   : > { %v1086_v46 = vmul.f32 0.17677669, %v1082_v45 }
 0x298   : > { %v1733_v47 = vpop.f32.mrf.mxu0 }
 0x299   : > { %v1087_v48 = vsel %vm744_vm2, %v1086_v46, -inf }
 0x29a   : > { %1088 = vmax.xlane.f32.xlu0 %v1087_v48 }
 0x2a9   : > { %v747_v49 = vpop.xlane.xlu1 %746 }
 0x2aa   : > { %v748_v50 = vsub.f32 %v743_v34, %v747_v49 }
 0x2ac   : > { %v749_v51 = vmul.f32 1.442695, %v748_v50 }
 0x2ad   : > { %v855_v52 = vpop.permute.xlu1 %854 }
 0x2ae   : > { %1837 = vpow2.f32 %v749_v51  ;;  %1714 = vmatpush3.msra.mxu1 %v855_v52 }
 0x2af   : > { %1715 = vmatprep.subr.mxu1 %v2043_v0 }
 0x2bb   : > { %v1838_v53 = vpop.eup %1837 }
 0x2bc   : > { %v751_v54 = vsel %vm744_vm2, %v1838_v53, 0.0 }
 0x2bd   : > { %752 = vadd.xlane.f32.xlu1 %v751_v54 }
 0x2ce   : > { %1100 = vrot.lane.b32.xlu1 %v2387_v39, %s2046_s24 }
 0x2d2   : > { %1098 = vrot.lane.b32.xlu1 %v2397_v55, %s2046_s24 }
 0x2d6   : > { %1180 = vrot.lane.b32.xlu1 %v2351_v26, %s2047_s21 }
 0x31b   : > { %v841_v56 = vpop.xlane.xlu0 %840 }
 0x31c   : > { %v842_v57 = vsub.f32 %v838_v42, %v841_v56 }
 0x31e   : > { %v843_v58 = vmul.f32 1.442695, %v842_v57 }
 0x320   : > { %1839 = vpow2.f32 %v843_v58 }
 0x323   : > { %v1089_v61 = vpop.xlane.xlu0 %1088 }
 0x324   : > { %v1090_v62 = vsub.f32 %v1086_v46, %v1089_v61  ;;  %v1353_v46 = vld [vmem:[%s2497_s5] sm:$0xff] }
 0x326   : > { %v1091_v63 = vmul.f32 1.442695, %v1090_v62 }
 0x328   : > { %1841 = vpow2.f32 %v1091_v63 }
 0x32d   : > { %v1840_v59 = vpop.eup %1839 }
 0x32e   : > { %v845_v60 = vsel %vm744_vm2, %v1840_v59, 0.0 }
 0x32f   : > { %846 = vadd.xlane.f32.xlu0 %v845_v60 }
 0x335   : > { %v1842_v1 = vpop.eup %1841 }
 0x336   : > { %v1093_v2 = vsel %vm744_vm2, %v1842_v1, 0.0 }
 0x345   : > { %852 = vrot.lane.b32.xlu0 %v2397_v55, %s2045_s7 }
 0x346   : > { %v753_v3 = vpop.xlane.xlu1 %752 }
 0x34a   : > { %v1101_v9 = vpop.permute.xlu1 %1100 }
 0x34e   : > { %v1099_v11 = vpop.permute.xlu1 %1098 }
 0x352   : > { %v1181_v16 = vpop.permute.xlu1 %1180 }
 0x364   : > { %1094 = vadd.xlane.f32.xlu0 %v1093_v2 }
 0x37a   : > { %1182 = vrot.lane.b32.xlu0 %v2343_v23, %s2047_s21 }
 0x37e   : > { %1178 = vrot.lane.b32.xlu0 %v2341_v22, %s2047_s21 }
 0x3b8   : > { %v847_v4 = vpop.xlane.xlu0 %846 }
 0x3b9   : > { %1843 = vrcp.f32 %v847_v4 }
 0x3ba   : > { %1845 = vrcp.f32 %v753_v3 }
 0x3bc   : > { %v853_v5 = vpop.permute.xlu0 %852 }
 0x3bd   : > { %1716 = vmatpush3.msra.mxu1 %v853_v5 }
 0x3be   : > { %1720 = vmatprep.subr.mxu1 %v2043_v0 }
 0x3c6   : > { %v1844_v6 = vpop.eup %1843 }
 0x3c7   : > { %v849_v7 = vmul.f32 %v1844_v6, %v1840_v59  ;;  %v1846_v8 = vpop.eup %1845 }
 0x3c8   : > { %v755_v10 = vmul.f32 %v1846_v8, %v1838_v53 }
 0x3c9   : > { %1718 = vmatmul.mubr.msk.f32.vlgmr.msra.gmra.mxu1 %vm744_vm2, %v849_v7 }
 0x3ca   : > { %1721 = vmatpush3.msra.mxu1 %v2387_v39  ;;  %1724 = vmatprep.mubr.msk.f32.mxu1 %vm2044_vm0, %v2043_v0 }
 0x3cb   : > { %1722 = vmatprep.subr.mxu1 %v2043_v0 }
 0x3cc   : > { %1723 = vmatpush3.msra.mxu1 %v2397_v55 }
 0x3cd   : > { %1734 = vmatprep.subr.mxu1 %v2043_v0  ;;  %1725 = vmatmul.mubr.msk.f32.vlgmr.msra.gmra.mxu1 %vm744_vm2, %v755_v10 }
 0x3ce   : > { %1735 = vmatpush3.msra.mxu1 %v1101_v9  ;;  %1738 = vmatprep.mubr.msk.f32.mxu1 %vm2044_vm0, %v2043_v0 }
 0x3cf   : > { %1736 = vmatprep.subr.mxu1 %v2043_v0 }
 0x3d0   : > { %1737 = vmatpush3.msra.mxu1 %v1099_v11 }
 0x3d1   : > { %1741 = vmatprep.subr.mxu1 %v2043_v0 }
 0x3ed   : > { %v1095_v12 = vpop.xlane.xlu0 %1094 }
 0x3ee   : > { %1847 = vrcp.f32 %v1095_v12 }
 0x3f1   : > { %v1183_v15 = vpop.permute.xlu0 %1182 }
 0x3f5   : > { %v1179_v17 = vpop.permute.xlu0 %1178 }
 0x3fb   : > { %v1848_v13 = vpop.eup %1847 }
 0x3fc   : > { %v1097_v14 = vmul.f32 %v1848_v13, %v1842_v1 }
 0x3fe   : > { %1739 = vmatmul.mubr.msk.f32.vlgmr.msra.gmra.mxu1 %vm744_vm2, %v1097_v14 }
 0x3ff   : > { %1742 = vmatpush3.xpose.msk.msra.mxu1 %vm402_vm1, %v1183_v15  ;;  %1745 = vmatprep.mubr.msk.f32.mxu1 %vm2044_vm0, %v2043_v0 }
 0x400   : > { %1743 = vmatprep.subr.mxu1 %v2043_v0 }
 0x403   : > { %1744 = vmatpush3.xpose.msk.msra.mxu1 %vm402_vm1, %v1181_v16 }
 0x406   : > { %1746 = vmatmul.mubr.msk.f32.vlgmr.msra.gmra.mxu1 %vm402_vm1, %v1179_v17 }
 0x489   : > { %v927_v18 = vpop.f32.mrf.mxu1 }
 0x48b   : > { %v1719_v19 = vpop.f32.mrf.mxu1 }
 0x48d   : > { %v1000_v20 = vpop.f32.mrf.mxu1 }
 0x48e   : > { %v1001_v21 = vadd.f32 %v1000_v20, %v927_v18 }
 0x48f   : > { %v1726_v22 = vpop.f32.mrf.mxu1 }
 0x4be   : > { %v1173_v23 = vpop.f32.mrf.mxu1 }
 0x4bf   : > { %v1177_v24 = vadd.f32 %v1173_v23, %v1001_v21 }
 0x4c0   : > { %v1740_v25 = vpop.f32.mrf.mxu1 }
 0x4c6   : > { %v1256_v26 = vpop.f32.mrf.mxu1 }
 0x4c7   : > { %v1260_v27 = vmul.f32 0.17677669, %v1256_v26 }
 0x4c8   : > { %v1747_v28 = vpop.f32.mrf.mxu1 }
 0x4c9   : > { %v1261_v29 = vsel %vm744_vm2, %v1260_v27, -inf }
 0x4ca   : > { %1262 = vmax.xlane.f32.xlu1 %v1261_v29 }
 0x4db   : > { %1272 = vrot.lane.b32.xlu1 %v2397_v55, %s2047_s21 }
 0x553   : > { %v1263_v30 = vpop.xlane.xlu1 %1262 }
 0x554   : > { %v1264_v31 = vsub.f32 %v1260_v27, %v1263_v30 }
 0x556   : > { %v1265_v32 = vmul.f32 1.442695, %v1264_v31 }
 0x557   : > { %v1273_v37 = vpop.permute.xlu1 %1272 }
 0x558   : > { %1849 = vpow2.f32 %v1265_v32 }
 0x565   : > { %v1850_v33 = vpop.eup %1849 }
 0x566   : > { %v1267_v34 = vsel %vm744_vm2, %v1850_v33, 0.0 }
 0x567   : > { %1268 = vadd.xlane.f32.xlu0 %v1267_v34 }
 0x57d   : > { %1274 = vrot.lane.b32.xlu0 %v2387_v39, %s2047_s21  ;;  %v1354_v39 = vld [vmem:[%s2498_s6] sm:$0xff] }
 0x57e   : > { %1357 = vperm.xlu1 %1835, %v1354_v39  }
 0x5f0   : > { %v1269_v35 = vpop.xlane.xlu0 %1268 }
 0x5f1   : > { %1851 = vrcp.f32 %v1269_v35 }
 0x5f4   : > { %v1275_v36 = vpop.permute.xlu0 %1274 }
 0x5f5   : > { %1749 = vmatpush3.msra.mxu0 %v1275_v36 }
 0x5f6   : > { %1750 = vmatprep.subr.mxu0 %v2043_v0 }
 0x5f7   : > { %1751 = vmatpush3.msra.mxu0 %v1273_v37 }
 0x5f8   : > { %1755 = vmatprep.subr.mxu0 %v2043_v0 }
 0x5fe   : > { %v1852_v38 = vpop.eup %1851 }
 0x5ff   : > { %v1271_v40 = vmul.f32 %v1852_v38, %v1850_v33 }
 0x601   : > { %1753 = vmatmul.mubr.msk.f32.vlgmr.msra.gmra.mxu0 %vm744_vm2, %v1271_v40 }
 0x602   : > { %1757 = vmatprep.mubr.msk.f32.mxu0 %vm2044_vm0, %v2043_v0  ;;  %v1358_v0 = vpop.permute.xlu1 %1357 }
 0x6c1   : > { %v1347_v42 = vpop.f32.mrf.mxu0 }
 0x6c2   : > { %v1351_v43 = vadd.f32 %v1347_v42, %v1177_v24 }
 0x6c3   : > { %v1754_v44 = vpop.f32.mrf.mxu0 }
 0x6c4   : > { %v1352_v45 = vmul.f32 0.25, %v1351_v43 }
 0x6c6   : > { %1756 = vmatpush3.msra.mxu0 %v1352_v45 }
 0x6c7   : > { %1758 = vmatmul.mubr.msk.f32.vlgmr.msra.gmra.mxu0 %vm1360_vm3, %v1353_v46 }
 0x787   : > { %v1430_v47 = vpop.f32.mrf.mxu0 }
 0x788   : > { %v1431_v48 = vadd.f32 %v1430_v47, %v1358_v0 }
 0x789   : > { %v1759_v49 = vpop.f32.mrf.mxu0 }
 0x78a   : > { %1434 = vst.msk [vmem:[%s385_s15] sm:$0xff] %vm402_vm1, %v1431_v48 }
 0x78b   : > { %1976 = shalt.err (!%p1973_p4)
}
 0x78c   : > { %s1977_s8 = scalar_lea.hbm %s2454_s14, 128  ;;  %s1981_s24 = scalar_lea.hbm %s2539_s13, 256 }
 0x78d   : > { %p1978_p0 = scmp.ne.s32.totalorder %s2454_s14, %s1977_s8  ;;  %p1982_p13 = scmp.lt.s32.totalorder %s2454_s14, %s2539_s13 }
 0x78e   : > { %p1983_p6 = scmp.lt.s32.totalorder %s1981_s24, %s1977_s8 }
 0x78f   : > { %p1979_p11 = pnand %p1978_p0, %p2540_p7 }
 0x790   : > { %p1984_p12 = por %p1983_p6, %p1982_p13 }
 0x791   : > { %p1980_p8 = pneg %p1979_p11 }
 0x793   : > { %p1985_p2 = pnand %p1984_p12, %p1980_p8 }
 0x795   : > { %1988 = shalt.err (!%p1985_p2)
}
 0x796   : > { %1770 = dma.vmem_to_hbm [thread:$0]  (%p2540_p7), %s1450_s18, 128, %s2454_s14, %s1436_s17  }
 0x797 PF: > { %s2541_s21 = sld [smem:[#allocation15_spill]] }
 0x798   : > { %s2542_s30 = sld [smem:[#allocation21_spill]] }
 0x799   : > { %s2543_s26 = sld [smem:[#allocation17_spill]] }
 0x79d   : > { %s1461_s10 = sand.u32 1, %s2541_s21  }
 0x79e   : > { %p2544_p1 = scmp.ne.s32.totalorder %s2542_s30, 0  ;;  %s1462_s27 = scalar_lea.sflag [#allocation4], %s1461_s10 }
 0x79f   : > { %p2545_p5 = scmp.ge.s32.totalorder %s2543_s26, 2 }
 0x7a1   : > { %p1787_p10 = pnand %p2545_p5, %p2544_p1 }
 0x7a3   : > { %p1788_p9 = pneg %p1787_p10 }
 0x7a5   : > { %2018 = dma.done.wait (%p1788_p9), %s1462_s27, 128  }
 0x7a6   : > { %2020 = vsyncadd (%p1788_p9), %s1462_s27, 4294967168  ;;  %s2546_s27 = sld [smem:[#allocation18_spill]]  ;;  %s2549_s24 = smov %s2027_s25 }
 0x7a7   : > { %s2547_s9 = sld [smem:[#allocation16_spill]] }
 0x7a8   : > { %s2548_s26 = sld [smem:[#allocation19_spill]] }
 0x7ac   : > { %p24_p3 = scmp.ge.s32.totalorder %s2546_s27, 4  }
 0x7ad   : > { %s2550_s25 = smov %s2547_s9 }
 0x7ae   :  { %26 = sbr.rel (!%p24_p3) target bundleno = 11 (0xb), region = 125 }
 0x7b3   :  { %1467 = vsyncpa [#allocation3], 1 }
 0x7b4   :  { %1469 = vsyncpa [#allocation3 + $0x1], 1 }
 0x7b5   :  { %1470 = vsyncpa [#allocation6], 1 }
 0x7b6   :  { %1472 = vsyncpa [#allocation6 + $0x1], 1 }
 0x7b7   :  { %1473 = vsyncpa [#allocation9], 1 }
 0x7b8   :  { %1474 = vsyncpa [#allocation4], 1 }
 0x7b9   :  { %1476 = vsyncpa [#allocation4 + $0x1], 1 }

</bundles_post_ra>
